<compile_context>
chip_gen: v6e
topology: v6e:2x2x1
jax: 0.10.0
libtpu: 0.0.40
codegen_flags: <defaults>
</compile_context>

<pallas_src>
import math

import jax
import jax.numpy as jnp
from jax.experimental import pallas as pl
from jax.experimental.pallas import tpu as pltpu


def _make_swish_kernel(compute_dtype):
    def _swish_kernel(x_ref, o_ref):
        x = x_ref[...].astype(compute_dtype)
        half = jnp.asarray(0.5, compute_dtype)
        one = jnp.asarray(1.0, compute_dtype)
        # sigmoid(x) = 0.5 * (tanh(0.5 * x) + 1): one EUP op; the mul/add run
        # on the (idle) VALU slots of this mem-bound kernel.
        sig = half * (jnp.tanh(half * x) + one)
        o_ref[...] = (x * sig).astype(o_ref.dtype)

    return _swish_kernel


def _device_kind():
    try:
        return jax.devices()[0].device_kind.lower()
    except Exception:  # pragma: no cover - defensive; fall back to generic path
        return ""


def swish(x, *, block_bytes=8 * 1024 * 1024, vmem_limit_bytes=48 * 1024 * 1024,
          min_pallas_elems=65536, donate_input=False):
    """Elementwise Swish for any input shape.

    Reshapes (free, contiguous) to a lane-dense (rows, lane) slab with lane a
    multiple of 128 that exactly divides the element count, tiles rows with a
    sublane-aligned block and a cdiv grid, then reshapes back.
    """
    orig_shape = x.shape
    total = math.prod(orig_shape) if orig_shape else 1

    # Small tensors: launch + plumbing dominate, fused XLA wins.
    if total < min_pallas_elems:
        return x * jax.nn.sigmoid(x)

    # Largest lane in {1024,512,256,128} that divides total -> no pad/slice.
    lane = 0
    for cand in (1024, 512, 256, 128):
        if total % cand == 0:
            lane = cand
            break
    if lane == 0:
        # total not a multiple of 128: a pad + slice would ~3x HBM traffic,
        # so use the fused-XLA swish (also near roofline) for this rare case.
        # TODO(synk): in-kernel masked tail store would keep this on Pallas.
        return x * jax.nn.sigmoid(x)

    rows = total // lane
    x2 = x.reshape(rows, lane)

    kind = _device_kind()
    is_v5e = ("v5 lite" in kind) or ("v5e" in kind) or ("v5litepod" in kind)
    is_v7x = ("v7" in kind) or ("7x" in kind)

    # v5e VPU/EUP have no bf16 support -> compute in f32 there; keep native
    # bf16 compute on v6e/v7x (packed vregs halve EUP pushes per element).
    if x.dtype == jnp.bfloat16 and not is_v5e:
        compute_dtype = jnp.bfloat16
    else:
        compute_dtype = jnp.float32

    # Sublane alignment for the IO dtype: 8 rows (4-byte), 16 (2-byte), ...
    itemsize = jnp.dtype(x.dtype).itemsize
    sub = max(8, 32 // max(1, itemsize))

    # Row block targeting ~block_bytes; double-buffered in+out ~4*block_bytes
    # stays well under vmem_limit_bytes on v5e/v6e (128 MiB) and v7x (64 MiB).
    rows_per_block = max(sub, (block_bytes // (lane * itemsize)) // sub * sub)
    br = min(rows_per_block, rows)
    if br < rows:
        br = max(sub, (br // sub) * sub)
    # v7x has 2 TensorCores: keep the grid at >= 2 steps (when splittable) so
    # the "parallel" axis can actually be sharded across them.
    if is_v7x and rows > 2 * sub and pl.cdiv(rows, br) < 2:
        br = max(sub, ((pl.cdiv(rows, 2) + sub - 1) // sub) * sub)

    grid = (pl.cdiv(rows, br),)

    out = pl.pallas_call(
        _make_swish_kernel(compute_dtype),
        out_shape=jax.ShapeDtypeStruct((rows, lane), x.dtype),
        grid=grid,
        in_specs=[pl.BlockSpec((br, lane), lambda i: (i, 0))],
        out_specs=pl.BlockSpec((br, lane), lambda i: (i, 0)),
        compiler_params=pltpu.CompilerParams(
            dimension_semantics=("parallel",),
            vmem_limit_bytes=vmem_limit_bytes,
        ),
        input_output_aliases={0: 0} if donate_input else {},
    )(x2)

    return out.reshape(orig_shape)


if __name__ == "__main__":
    key = jax.random.PRNGKey(0)

    # Transformer-style activation input (batch=2, seq=8, hidden=32); forced
    # through the Pallas kernel by disabling the small-tensor fallback.
    x = jax.random.normal(key, (2, 8, 32), dtype=jnp.float32)
    y = swish(x, min_pallas_elems=0)
    jax.block_until_ready(y)
    y_ref = x * jax.nn.sigmoid(x)
    assert y.shape == x.shape and y.dtype == x.dtype
    assert jnp.allclose(y, y_ref, atol=1e-5, rtol=1e-5)

    # Multi-block grid path (block size forced small so this modest shape
    # still exercises several grid steps).
    x2 = jax.random.normal(jax.random.PRNGKey(1), (4, 128, 256), dtype=jnp.float32)
    y2 = swish(x2, block_bytes=64 * 1024, min_pallas_elems=0)
    jax.block_until_ready(y2)
    assert jnp.allclose(y2, x2 * jax.nn.sigmoid(x2), atol=1e-5, rtol=1e-5)

    # bf16 path (native bf16 compute on v6e/v7x, f32 compute on v5e).
    x3 = jax.random.normal(jax.random.PRNGKey(2), (2, 64, 128), dtype=jnp.bfloat16)
    y3 = swish(x3, min_pallas_elems=0)
    jax.block_until_ready(y3)
    y3_ref = (x3.astype(jnp.float32) * jax.nn.sigmoid(x3.astype(jnp.float32)))
    assert y3.dtype == x3.dtype
    assert jnp.allclose(y3.astype(jnp.float32), y3_ref, atol=5e-2, rtol=5e-2)

    # Ragged total (not a multiple of 128) -> fused-XLA fallback path.
    x4 = jax.random.normal(jax.random.PRNGKey(3), (3, 100, 40), dtype=jnp.float32)
    y4 = swish(x4)
    jax.block_until_ready(y4)
    assert jnp.allclose(y4, x4 * jax.nn.sigmoid(x4), atol=1e-5, rtol=1e-5)

    print("KERNEL_OK")
</pallas_src>

<mosaic_0001>
module attributes {stable_mosaic.version = 11 : i64} {
  func.func @_swish_kernel(%arg0: i32, %arg1: memref<1x512xf32, #tpu.memory_space<vmem>>, %arg2: memref<1x512xf32, #tpu.memory_space<vmem>>) attributes {dimension_semantics = [#tpu.dimension_semantics<parallel>], iteration_bounds = array<i64: 1>, scalar_prefetch = 0 : i64, scratch_operands = 0 : i64, tpu.core_type = #tpu.core_type<tc>, window_params = [{transform_indices = @transform_0, window_bounds = array<i64: 1, 512>}, {transform_indices = @transform_1, window_bounds = array<i64: 1, 512>}]} {
    %c0 = arith.constant 0 : index
    %c0_0 = arith.constant 0 : index
    %0 = vector.load %arg1[%c0, %c0_0] : memref<1x512xf32, #tpu.memory_space<vmem>>, vector<1x512xf32>
    %cst = arith.constant 5.000000e-01 : f32
    %1 = vector.broadcast %cst : f32 to vector<1x512xf32>
    %2 = arith.mulf %1, %0 : vector<1x512xf32>
    %3 = math.tanh %2 : vector<1x512xf32>
    %cst_1 = arith.constant 1.000000e+00 : f32
    %4 = vector.broadcast %cst_1 : f32 to vector<1x512xf32>
    %5 = arith.addf %3, %4 : vector<1x512xf32>
    %cst_2 = arith.constant 5.000000e-01 : f32
    %6 = vector.broadcast %cst_2 : f32 to vector<1x512xf32>
    %7 = arith.mulf %6, %5 : vector<1x512xf32>
    %8 = arith.mulf %0, %7 : vector<1x512xf32>
    %c0_3 = arith.constant 0 : index
    %c0_4 = arith.constant 0 : index
    %9 = vector.load %arg2[%c0_3, %c0_4] : memref<1x512xf32, #tpu.memory_space<vmem>>, vector<1x512xf32>
    tpu.vector_store %arg2[%c0_3, %c0_4], %8 {strides = array<i32>} : memref<1x512xf32, #tpu.memory_space<vmem>>, vector<1x512xf32>,
    return
  }
  func.func @transform_0(%arg0: i32) -> (i32, i32) {
    %c0_i32 = arith.constant 0 : i32
    %c0_i32_0 = arith.constant 0 : i32
    return %arg0, %c0_i32 : i32, i32
  }
  func.func @transform_1(%arg0: i32) -> (i32, i32) {
    %c0_i32 = arith.constant 0 : i32
    %c0_i32_0 = arith.constant 0 : i32
    return %arg0, %c0_i32 : i32, i32
  }
}

</mosaic_0001>

<bundles_post_ra>
// kernel: tpu_custom_call.1
= control target key start
LH: loop header
LB: loop body
LE: loop exit
PB: predicated region body
PF: predicated region fallthrough
CT: control target
= control target key end

     0   :  { %6 = vsyncpa [#allocation3], 0  ;;  %s113_s0 = inlined_call_operand.hbm [shape: f32[1,512], index: 0, kind: input, shape index: {}]   ;;  %s114_s1 = inlined_call_operand.hbm [shape: f32[1,512], index: 1, kind: output, shape index: {}]  }
   0x1   :  { %7 = vsyncpa [#allocation4], 0  ;;  %s95_s6 = smov [#allocation2]  }
   0x2   :  { %s14_s7 = sshll.u32 %s95_s6, 4  ;;  %s15_s7 = int_to_ptr.vmem [resolvable:$true] %s14_s7 }
   0x3   :  { %s59_s8 = scalar_lea.vmem %s15_s7, 64  ;;  %p64_p1 = scmp.lt.s32.totalorder %s15_s7, %s15_s7 }
   0x4   :  { %p60_p0 = scmp.ne.s32.totalorder %s15_s7, %s59_s8  ;;  %p65_p2 = scmp.lt.s32.totalorder %s59_s8, %s59_s8 }
   0x6   :  { %p66_p3 = por %p65_p2, %p64_p1 }
   0x8   :  { %p67_p4 = pnand %p66_p3, %p60_p0 }
   0xa   :  { %70 = shalt.err (!%p67_p4)
}
   0xb   :  { %17 = dma.hbm_to_vmem [thread:$0]  %s113_s0, 64, %s15_s7, [#allocation3]  }
   0xc   :  { %91 = dma.done.wait [#allocation3], 64  }
   0xd   :  { %92 = vsyncadd [#allocation3], 4294967232  ;;  %v21_v0 = vld [vmem:[#allocation2] sm:$0xf]  ;;  %v27_v3 = vlaneseq  ;;  %s96_s11 = smov [#allocation5]  }
   0xe   :  { %v22_v1 = vmul.f32 0.5, %v21_v0  ;;  %s38_s12 = sshll.u32 %s96_s11, 4  ;;  %s39_s12 = int_to_ptr.vmem [resolvable:$true] %s38_s12 }
   0xf   :  { %vm29_vm0 = vcmp.lt.s32.totalorder %v27_v3, 512  ;;  %s71_s13 = scalar_lea.vmem %s39_s12, 64  ;;  %p76_p6 = scmp.lt.s32.totalorder %s39_s12, %s39_s12 }
  0x10   :  { %49 = vtanh.f32 %v22_v1  ;;  %p72_p5 = scmp.ne.s32.totalorder %s39_s12, %s71_s13  ;;  %p77_p7 = scmp.lt.s32.totalorder %s71_s13, %s71_s13 }
  0x12   :  { %p78_p8 = por %p77_p7, %p76_p6 }
  0x14   :  { %p79_p9 = pnand %p78_p8, %p72_p5 }
  0x1d   :  { %v50_v2 = vpop.eup %49 }
  0x1e   :  { %v24_v4 = vadd.f32 1.0, %v50_v2 }
  0x20   :  { %v25_v5 = vmul.f32 0.5, %v24_v4 }
  0x22   :  { %v26_v6 = vmul.f32 %v25_v5, %v21_v0 }
  0x24   :  { %31 = vst.msk [vmem:[#allocation5] sm:$0xf] %vm29_vm0, %v26_v6 }
  0x25   :  { %82 = shalt.err (!%p79_p9)
}
  0x26   :  { %41 = dma.vmem_to_hbm [thread:$0]  %s39_s12, 64, %s114_s1, [#allocation4]  }
  0x27   :  { %93 = dma.done.wait [#allocation4], 64  }
  0x28   :  { %94 = vsyncadd [#allocation4], 4294967232 }
  0x29   :  { %45 = vsyncpa [#allocation3], 1 }
  0x2a   :  { %46 = vsyncpa [#allocation4], 1 }

</bundles_post_ra>
